<compile_context>
chip_gen: v5e
topology: v5e:2x2
jax: 0.10.0
libtpu: 0.0.40
codegen_flags: <defaults>
</compile_context>

<pallas_src>
import functools

import jax
import jax.numpy as jnp
from jax.experimental import pallas as pl
from jax.experimental.pallas import tpu as pltpu


# ---------------------------------------------------------------------------
# Pallas kernel:  weight [OC, Kp]  x  patch tile [tm, Kp]  ->  [OC, tm]
# (bias is already folded into the K dimension as a ones column / bias column)
# ---------------------------------------------------------------------------
def _coordconv_matmul_kernel(w_ref, p_ref, o_ref):
    acc = jax.lax.dot_general(
        w_ref[...], p_ref[...],
        dimension_numbers=(((1,), (1,)), ((), ())),   # contract K on both
        preferred_element_type=jnp.float32,
    )
    o_ref[...] = acc.astype(o_ref.dtype)


def _pick_tm(M, Kp, OC, vmem_budget=16 * 1024 * 1024, cap=4096):
    """128-aligned row tile, VMEM-capped, >= 2 grid steps when possible."""
    m128 = pl.cdiv(M, 128) * 128
    # Double-buffered f32 patch tile + output tile per row of the tile.
    per_row_bytes = (Kp + OC) * 4 * 2
    vmem_cap = max(128, (vmem_budget // per_row_bytes) // 128 * 128)
    cap = min(cap, vmem_cap)
    if m128 <= 128:
        return 128
    half = max(128, (m128 // 2) // 128 * 128)   # >=2 steps -> v7x dual TC
    return min(cap, half)


def _pallas_matmul(w_flat, patches, *, tm):
    """w_flat: [OC, Kp], patches: [M_pad, Kp] (M_pad % tm == 0) -> [OC, M_pad]."""
    OC, Kp = w_flat.shape
    M_pad, Kp2 = patches.shape
    assert Kp == Kp2 and M_pad % tm == 0

    return pl.pallas_call(
        _coordconv_matmul_kernel,
        out_shape=jax.ShapeDtypeStruct((OC, M_pad), jnp.float32),
        grid_spec=pltpu.PrefetchScalarGridSpec(
            num_scalar_prefetch=0,
            grid=(M_pad // tm,),
            in_specs=[
                pl.BlockSpec((OC, Kp), lambda i: (0, 0)),   # weight, resident
                pl.BlockSpec((tm, Kp), lambda i: (i, 0)),   # patch row tile
            ],
            out_specs=pl.BlockSpec((OC, tm), lambda i: (0, i)),
        ),
        compiler_params=pltpu.CompilerParams(
            dimension_semantics=("parallel",),
        ),
    )(w_flat, patches)


# ---------------------------------------------------------------------------
# CoordConv2d forward
# ---------------------------------------------------------------------------
def coord_conv2d(x, weight, bias, *, stride=1, padding=0, dilation=1):
    """x: [B, C, H, W] (NCHW, f32); weight: [OC, C+2, KH, KW]; bias: [OC]."""
    B, C, H, W = x.shape
    OC, Cin, KH, KW = weight.shape
    assert Cin == C + 2

    # --- coordinate channels, generated directly in channels-last layout ---
    x_nhwc = jnp.transpose(x, (0, 2, 3, 1))  # [B, H, W, C]
    c1 = jnp.broadcast_to(
        jnp.linspace(0.0, 1.0, H, dtype=x.dtype).reshape(1, H, 1, 1),
        (B, H, W, 1))
    c2 = jnp.broadcast_to(
        jnp.linspace(0.0, 1.0, W, dtype=x.dtype).reshape(1, 1, W, 1),
        (B, H, W, 1))
    x_aug = jnp.concatenate([x_nhwc, c1, c2], axis=-1)  # [B, H, W, Cin]

    # --- im2col directly in channels-last / K-trailing order (no big transpose)
    OH = (H + 2 * padding - dilation * (KH - 1) - 1) // stride + 1
    OW = (W + 2 * padding - dilation * (KW - 1) - 1) // stride + 1
    xp = jnp.pad(x_aug, ((0, 0), (padding, padding), (padding, padding), (0, 0)))

    cols = []
    for ki in range(KH):
        for kj in range(KW):
            hi = ki * dilation
            wj = kj * dilation
            cols.append(
                xp[:,
                   hi:hi + (OH - 1) * stride + 1:stride,
                   wj:wj + (OW - 1) * stride + 1:stride,
                   :])  # [B, OH, OW, Cin]
    # Stack on a new trailing axis: [B, OH, OW, Cin, KH*KW]; flattening the
    # last two axes yields K ordered as (cin, kh, kw), matching
    # weight.reshape(OC, Cin*KH*KW).
    K = Cin * KH * KW
    patches = jnp.stack(cols, axis=-1).reshape(B, OH, OW, K)

    # Lane-aligned K padding with one extra slot reserved for the bias column
    # (bias add folded into the matmul; remaining padded columns are zero on
    # both operands, hence inert).
    Kp = pl.cdiv(K + 1, 128) * 128
    M = B * OH * OW
    tm = _pick_tm(M, Kp, OC)
    M_pad = pl.cdiv(M, tm) * tm

    patches = patches.reshape(M, K)
    patches = jnp.concatenate(
        [patches, jnp.ones((M, 1), dtype=patches.dtype)], axis=-1)   # ones col
    patches = jnp.pad(patches, ((0, M_pad - M), (0, Kp - (K + 1))))
    patches = patches.astype(jnp.float32)

    w_flat = weight.reshape(OC, K)
    w_flat = jnp.concatenate([w_flat, bias.reshape(OC, 1)], axis=-1)  # bias col
    w_flat = jnp.pad(w_flat, ((0, 0), (0, Kp - (K + 1)))).astype(jnp.float32)

    # --- hot path: Pallas matmul (bias fused), lane-dense (OC, M) output ---
    out = _pallas_matmul(w_flat, patches, tm=tm)          # [OC, M_pad]

    # [OC, M] -> [OC, B, OH, OW] -> [B, OC, OH, OW]  (cheap leading-axis swap)
    out = out[:, :M].reshape(OC, B, OH, OW)
    return jnp.transpose(out, (1, 0, 2, 3)).astype(x.dtype)


# ---------------------------------------------------------------------------
if __name__ == "__main__":
    key = jax.random.PRNGKey(0)
    kx, kw, kb = jax.random.split(key, 3)

    # Module config: in_channels=4, out_channels=8, kernel_size=3, padding=1
    B, C, H, W = 2, 4, 16, 16
    OC, KH, KW = 8, 3, 3
    stride, padding, dilation = 1, 1, 1

    x = jax.random.normal(kx, (B, C, H, W), dtype=jnp.float32)
    fan_in = (C + 2) * KH * KW
    weight = jax.random.normal(kw, (OC, C + 2, KH, KW), dtype=jnp.float32) / jnp.sqrt(fan_in)
    bias = jax.random.normal(kb, (OC,), dtype=jnp.float32) * 0.05

    fwd = jax.jit(functools.partial(coord_conv2d, stride=stride,
                                    padding=padding, dilation=dilation))
    out = fwd(x, weight, bias)
    jax.block_until_ready(out)

    # Pure-JAX reference check (lax conv on the coord-augmented input)
    coords1 = jnp.broadcast_to(jnp.linspace(0, 1, H).reshape(1, 1, H, 1), (B, 1, H, W))
    coords2 = jnp.broadcast_to(jnp.linspace(0, 1, W).reshape(1, 1, 1, W), (B, 1, H, W))
    x_aug = jnp.concatenate([x, coords1.astype(x.dtype), coords2.astype(x.dtype)], axis=1)
    ref = jax.lax.conv_general_dilated(
        x_aug, weight, window_strides=(stride, stride),
        padding=[(padding, padding), (padding, padding)],
        rhs_dilation=(dilation, dilation),
        dimension_numbers=("NCHW", "OIHW", "NCHW"),
    ) + bias.reshape(1, OC, 1, 1)

    assert out.shape == (B, OC, H, W), out.shape
    assert jnp.allclose(out, ref, atol=1e-4, rtol=1e-4), float(jnp.max(jnp.abs(out - ref)))
    print("KERNEL_OK")
</pallas_src>

<mosaic_0001>
module attributes {stable_mosaic.version = 11 : i64} {
  func.func @_coordconv_matmul_kernel(%arg0: i32, %arg1: memref<8x128xf32, #tpu.memory_space<vmem>>, %arg2: memref<256x128xf32, #tpu.memory_space<vmem>>, %arg3: memref<8x256xf32, #tpu.memory_space<vmem>>) attributes {dimension_semantics = [#tpu.dimension_semantics<parallel>], iteration_bounds = array<i64: 2>, scalar_prefetch = 0 : i64, scratch_operands = 0 : i64, tpu.core_type = #tpu.core_type<tc>, window_params = [{pipeline_mode = #tpu.pipeline_mode<synchronous>, transform_indices = @transform_0, window_bounds = array<i64: 8, 128>}, {transform_indices = @transform_1, window_bounds = array<i64: 256, 128>}, {transform_indices = @transform_2, window_bounds = array<i64: 8, 256>}]} {
    %c0 = arith.constant 0 : index
    %c0_0 = arith.constant 0 : index
    %0 = vector.load %arg1[%c0, %c0_0] : memref<8x128xf32, #tpu.memory_space<vmem>>, vector<8x128xf32>
    %c0_1 = arith.constant 0 : index
    %c0_2 = arith.constant 0 : index
    %1 = vector.load %arg2[%c0_1, %c0_2] : memref<256x128xf32, #tpu.memory_space<vmem>>, vector<256x128xf32>
    %cst = arith.constant dense<0.000000e+00> : vector<8x256xf32>
    %2 = tpu.matmul %0, %1, %cst {dimension_numbers = #tpu.dot_dimension_numbers<[1], [1], [0], [0], [0, 0, 1, 0], [], []>} : vector<8x128xf32>, vector<256x128xf32>, vector<8x256xf32> -> vector<8x256xf32>
    %c0_3 = arith.constant 0 : index
    %c0_4 = arith.constant 0 : index
    %3 = vector.load %arg3[%c0_3, %c0_4] : memref<8x256xf32, #tpu.memory_space<vmem>>, vector<8x256xf32>
    tpu.vector_store %arg3[%c0_3, %c0_4], %2 {strides = array<i32>} : memref<8x256xf32, #tpu.memory_space<vmem>>, vector<8x256xf32>,
    return
  }
  func.func @transform_0(%arg0: i32) -> (i32, i32) {
    %c0_i32 = arith.constant 0 : i32
    %c0_i32_0 = arith.constant 0 : i32
    %c0_i32_1 = arith.constant 0 : i32
    return %c0_i32, %c0_i32_0 : i32, i32
  }
  func.func @transform_1(%arg0: i32) -> (i32, i32) {
    %c0_i32 = arith.constant 0 : i32
    %c0_i32_0 = arith.constant 0 : i32
    return %arg0, %c0_i32 : i32, i32
  }
  func.func @transform_2(%arg0: i32) -> (i32, i32) {
    %c0_i32 = arith.constant 0 : i32
    %c0_i32_0 = arith.constant 0 : i32
    return %c0_i32, %arg0 : i32, i32
  }
}

</mosaic_0001>

<bundles_post_ra>
// kernel: coord_conv2d.1
= control target key start
LH: loop header
LB: loop body
LE: loop exit
PB: predicated region body
PF: predicated region fallthrough
CT: control target
= control target key end

     0   :  { %s320_s9 = smov 0   ;;  %s378_s0 = inlined_call_operand.vmem [shape: f32[8,128], index: 0, kind: input, shape index: {}]   ;;  %s379_s1 = inlined_call_operand.vmem [shape: f32[512,128], index: 1, kind: input, shape index: {}]   ;;  %s380_s2 = inlined_call_operand.vmem [shape: f32[8,512], index: 2, kind: output, shape index: {}]  }
   0x1 LB: > { %s278_s10 = sadd.s32 4294967295, %s303_s9   ;;  %p282_p0 = scmp.ge.s32.totalorder %s303_s9, 1  ;;  %s303_s9 = sphi %s320_s9, %s12_s9  }
   0x2   : > { %p113_p1 = scmp.lt.s32.totalorder %s303_s9, 3 }
   0x4   : > { %p114_p2 = pnand %p282_p0, %p113_p1 }
   0x5   : > { %s283_s11 = sshll.u32 (!%p114_p2), %s278_s10, 5  ;;  %s285_s18 = sshll.u32 (!%p114_p2), %s278_s10, 1 }
   0x6   : > { %117 = sbr.rel (%p114_p2) target bundleno = 206 (0xce), region = 28  ;;  %p136_p3 = scmp.lt.s32.totalorder (!%p114_p2), %s283_s11, 63 }
   0x7   : > { %p142_p4 = scmp.lt.s32.totalorder (!%p114_p2), %s285_s18, 3 }
   0xb   : > { %s382_s11 = smov (!%p136_p3, %s283_s11), 63  ;;  %v147_v32 = vld [vmem:[%s378_s0] sm:$0xff]  ;;  %s384_s18 = smov (!%p142_p4, %s285_s18), 3 }
   0xc   : > { %s284_s12 = sshll.u32 %s382_s11, 3  ;;  %s286_s19 = sshll.u32 %s384_s18, 3 }
   0xd   : > { %s333_s15 = scalar_lea.vmem %s379_s1, %s284_s12  ;;  %s145_s22 = scalar_lea.vmem %s380_s2, %s286_s19 }
   0xe   : > { %v163_v0 = vld [vmem:[%s333_s15 + $0x78] sm:$0xff]  ;;  %v162_v2 = vld [vmem:[%s333_s15 + $0x70] sm:$0xff]  ;;  %v161_v4 = vld [vmem:[%s333_s15 + $0x68] sm:$0xff] }
   0xf   : > { %v179_v1 = vld [vmem:[%s333_s15 + $0xf8] sm:$0xff]  ;;  %180 = vmatpush.xpose.msra.mxu0 %v163_v0  ;;  %v178_v3 = vld [vmem:[%s333_s15 + $0xf0] sm:$0xff]  ;;  %v177_v5 = vld [vmem:[%s333_s15 + $0xe8] sm:$0xff] }
  0x10   : > { %200 = vmatpush.xpose.msra.mxu1 %v179_v1  ;;  %v160_v6 = vld [vmem:[%s333_s15 + $0x60] sm:$0xff]  ;;  %v159_v8 = vld [vmem:[%s333_s15 + $0x58] sm:$0xff]  ;;  %v158_v10 = vld [vmem:[%s333_s15 + $0x50] sm:$0xff] }
  0x11   : > { %v176_v7 = vld [vmem:[%s333_s15 + $0xe0] sm:$0xff]  ;;  %v175_v9 = vld [vmem:[%s333_s15 + $0xd8] sm:$0xff]  ;;  %v174_v11 = vld [vmem:[%s333_s15 + $0xd0] sm:$0xff] }
  0x12   : > { %v157_v12 = vld [vmem:[%s333_s15 + $0x48] sm:$0xff]  ;;  %v156_v14 = vld [vmem:[%s333_s15 + $0x40] sm:$0xff]  ;;  %v155_v16 = vld [vmem:[%s333_s15 + $0x38] sm:$0xff] }
  0x13   : > { %181 = vmatpush.xpose.msra.mxu0 %v162_v2  ;;  %v173_v13 = vld [vmem:[%s333_s15 + $0xc8] sm:$0xff]  ;;  %v172_v15 = vld [vmem:[%s333_s15 + $0xc0] sm:$0xff]  ;;  %v171_v17 = vld [vmem:[%s333_s15 + $0xb8] sm:$0xff] }
  0x14   : > { %201 = vmatpush.xpose.msra.mxu1 %v178_v3  ;;  %v154_v18 = vld [vmem:[%s333_s15 + $0x30] sm:$0xff]  ;;  %v153_v20 = vld [vmem:[%s333_s15 + $0x28] sm:$0xff]  ;;  %v152_v22 = vld [vmem:[%s333_s15 + $0x20] sm:$0xff] }
  0x15   : > { %v170_v19 = vld [vmem:[%s333_s15 + $0xb0] sm:$0xff]  ;;  %v169_v21 = vld [vmem:[%s333_s15 + $0xa8] sm:$0xff]  ;;  %v168_v23 = vld [vmem:[%s333_s15 + $0xa0] sm:$0xff] }
  0x16   : > { %v151_v24 = vld [vmem:[%s333_s15 + $0x18] sm:$0xff]  ;;  %v150_v26 = vld [vmem:[%s333_s15 + $0x10] sm:$0xff]  ;;  %v149_v28 = vld [vmem:[%s333_s15 + $0x8] sm:$0xff] }
  0x17   : > { %182 = vmatpush.xpose.msra.mxu0 %v161_v4  ;;  %v167_v25 = vld [vmem:[%s333_s15 + $0x98] sm:$0xff]  ;;  %v166_v27 = vld [vmem:[%s333_s15 + $0x90] sm:$0xff]  ;;  %v165_v29 = vld [vmem:[%s333_s15 + $0x88] sm:$0xff] }
  0x18   : > { %202 = vmatpush.xpose.msra.mxu1 %v177_v5  ;;  %v148_v30 = vld [vmem:[%s333_s15] sm:$0xff] }
  0x19   : > { %v164_v31 = vld [vmem:[%s333_s15 + $0x80] sm:$0xff] }
  0x1b   : > { %183 = vmatpush.xpose.msra.mxu0 %v160_v6 }
  0x1c   : > { %203 = vmatpush.xpose.msra.mxu1 %v176_v7 }
  0x1f   : > { %184 = vmatpush.xpose.msra.mxu0 %v159_v8 }
  0x20   : > { %204 = vmatpush.xpose.msra.mxu1 %v175_v9 }
  0x23   : > { %185 = vmatpush.xpose.msra.mxu0 %v158_v10 }
  0x24   : > { %205 = vmatpush.xpose.msra.mxu1 %v174_v11 }
  0x27   : > { %186 = vmatpush.xpose.msra.mxu0 %v157_v12 }
  0x28   : > { %206 = vmatpush.xpose.msra.mxu1 %v173_v13 }
  0x2b   : > { %187 = vmatpush.xpose.msra.mxu0 %v156_v14 }
  0x2c   : > { %207 = vmatpush.xpose.msra.mxu1 %v172_v15 }
  0x2f   : > { %188 = vmatpush.xpose.msra.mxu0 %v155_v16 }
  0x30   : > { %208 = vmatpush.xpose.msra.mxu1 %v171_v17 }
  0x33   : > { %189 = vmatpush.xpose.msra.mxu0 %v154_v18 }
  0x34   : > { %209 = vmatpush.xpose.msra.mxu1 %v170_v19 }
  0x37   : > { %190 = vmatpush.xpose.msra.mxu0 %v153_v20 }
  0x38   : > { %210 = vmatpush.xpose.msra.mxu1 %v169_v21 }
  0x3b   : > { %191 = vmatpush.xpose.msra.mxu0 %v152_v22 }
  0x3c   : > { %211 = vmatpush.xpose.msra.mxu1 %v168_v23 }
  0x3f   : > { %192 = vmatpush.xpose.msra.mxu0 %v151_v24 }
  0x40   : > { %212 = vmatpush.xpose.msra.mxu1 %v167_v25 }
  0x43   : > { %193 = vmatpush.xpose.msra.mxu0 %v150_v26 }
  0x44   : > { %213 = vmatpush.xpose.msra.mxu1 %v166_v27 }
  0x47   : > { %194 = vmatpush.xpose.msra.mxu0 %v149_v28 }
  0x48   : > { %214 = vmatpush.xpose.msra.mxu1 %v165_v29 }
  0x4b   : > { %195 = vmatpush.xpose.msra.mxu0 %v148_v30 }
  0x4c   : > { %215 = vmatpush.xpose.msra.mxu1 %v164_v31 }
  0x4e   : > { %196 = vmatmul.f32.vlgmr.msra.gmra.mxu0 %v147_v32 }
  0x4f   : > { %216 = vmatmul.f32.vlgmr.msra.gmra.mxu1 %v147_v32 }
  0xcb   : > { %v197_v33 = vpop.f32.mrf.mxu0 }
  0xcc   : > { %v217_v34 = vpop.f32.mrf.mxu1  ;;  %220 = vst [vmem:[%s145_s22] sm:$0xff] %v197_v33 }
  0xcd   : > { %221 = vst [vmem:[%s145_s22 + $0x8] sm:$0xff] %v217_v34 }
  0xce PF: > { %s12_s9 = sadd.s32 1, %s303_s9  }
  0xcf   : > { %p9_p5 = scmp.ge.s32.totalorder %s12_s9, 4  }
  0xd1   :  { %11 = sbr.rel (!%p9_p5) target bundleno = 1 (0x1), region = 58 }

</bundles_post_ra>
